<compile_context>
chip_gen: v7x
topology: tpu7x:2x2x1
jax: 0.10.0
libtpu: 0.0.40
codegen_flags: <defaults>
</compile_context>

<pallas_src>
import jax
import jax.numpy as jnp
from jax.experimental import pallas as pl
from jax.experimental.pallas import tpu as pltpu

IN_FEATURES = 2 * 33      # 66
HIDDEN = 128
OUT_FEATURES = 3
OUT_PAD = 8               # padded output columns (full-array last dim block)
MAX_TILE_B = 4096         # max rows per grid step
SPLIT_THRESHOLD = 2048    # batches >= this get >=2 grid steps (v7x: 2 TCs)


def _round_up(n, m):
    return ((n + m - 1) // m) * m


def _choose_tile_b(b_pad):
    """Largest useful batch tile; split big batches into >=2 steps for megacore."""
    if b_pad <= SPLIT_THRESHOLD:
        return b_pad                          # single step, whole batch resident
    half = _round_up(pl.cdiv(b_pad, 2), 16)   # aim for >= 2 (ideally even) steps
    return min(MAX_TILE_B, half)


def mlp_kernel(x_ref, w1_ref, b1_ref, wc_ref, bc_ref, o_ref):
    """relu(x @ W1 + b1) @ W_c + b_c   (bf16 MXU operands, f32 accumulation)."""
    x = x_ref[...].astype(jnp.bfloat16)                          # [tb, 66] bf16
    h = jnp.dot(x, w1_ref[...], preferred_element_type=jnp.float32)
    h = jnp.maximum(h + b1_ref[...], 0.0)                        # fc1 + ReLU (f32)
    # dropout1/2/3: identity (eval mode); fc2..fc4 folded into (W_c, b_c).
    out = jnp.dot(h.astype(jnp.bfloat16), wc_ref[...],
                  preferred_element_type=jnp.float32) + bc_ref[...]
    o_ref[...] = out                                             # [tb, 8] f32


def mycnn_forward(x, kernel_params):
    """x: [B, 66] float32 -> [B, 3] float32 (eval-mode MyCNN forward)."""
    w1, b1, wc, bc = kernel_params
    B = x.shape[0]

    # Round batch to a multiple of 16 (bf16 sublane packing).  Pad is <= 15
    # rows and is elided by XLA when B is already a multiple of 16.
    b_pad = _round_up(B, 16)
    x_p = jnp.pad(x, ((0, b_pad - B), (0, 0)))                   # stays f32, 66-wide

    tile_b = _choose_tile_b(b_pad)
    grid_b = pl.cdiv(b_pad, tile_b)   # ragged last tile handled by Pallas masking

    flops = 2 * b_pad * IN_FEATURES * HIDDEN + 2 * b_pad * HIDDEN * OUT_PAD
    bytes_accessed = (x_p.size * 4 + b_pad * OUT_PAD * 4
                      + w1.size * 2 + wc.size * 2 + b1.size * 4 + bc.size * 4)

    out = pl.pallas_call(
        mlp_kernel,
        out_shape=jax.ShapeDtypeStruct((b_pad, OUT_PAD), jnp.float32),
        grid=(grid_b,),
        in_specs=[
            pl.BlockSpec((tile_b, IN_FEATURES), lambda i: (i, 0)),  # x: batch-tiled
            pl.BlockSpec((IN_FEATURES, HIDDEN), lambda i: (0, 0)),  # W1: resident
            pl.BlockSpec((1, HIDDEN), lambda i: (0, 0)),            # b1: resident
            pl.BlockSpec((HIDDEN, OUT_PAD), lambda i: (0, 0)),      # W_c: resident
            pl.BlockSpec((1, OUT_PAD), lambda i: (0, 0)),           # b_c: resident
        ],
        out_specs=pl.BlockSpec((tile_b, OUT_PAD), lambda i: (i, 0)),
        compiler_params=pltpu.CompilerParams(
            dimension_semantics=(pltpu.PARALLEL,)),
        cost_estimate=pl.CostEstimate(
            flops=flops, transcendentals=0, bytes_accessed=bytes_accessed),
    )(x_p, w1, b1, wc, bc)

    return out[:B, :OUT_FEATURES]


def init_linear(key, fan_in, fan_out):
    """nn.Linear-style init (U(+/- 1/sqrt(fan_in))); weight stored [in, out]."""
    kw, kb = jax.random.split(key)
    bound = 1.0 / jnp.sqrt(fan_in)
    w = jax.random.uniform(kw, (fan_in, fan_out), jnp.float32, -bound, bound)
    b = jax.random.uniform(kb, (1, fan_out), jnp.float32, -bound, bound)
    return w, b


def make_params(key):
    k1, k2, k3, k4 = jax.random.split(key, 4)
    return (
        init_linear(k1, IN_FEATURES, 128),
        init_linear(k2, 128, 256),
        init_linear(k3, 256, 64),
        init_linear(k4, 64, OUT_FEATURES),
    )


def fold_params(params):
    """Pre-fold fc2..fc4 (exact in eval mode) and pad/cast to kernel layout."""
    (w1, b1), (w2, b2), (w3, b3), (w4, b4) = params

    wc = w2 @ w3 @ w4                       # [128, 3]
    bc = (b2 @ w3 + b3) @ w4 + b4           # [1, 3]

    # W1 stays [66, 128] (K=66 is padded internally by Mosaic).  Output columns
    # padded 3 -> 8 (wrapper slices them off); weights cast to bf16 for MXU.
    w1_p = w1.astype(jnp.bfloat16)                                        # [66, 128]
    wc_p = jnp.pad(wc, ((0, 0), (0, OUT_PAD - OUT_FEATURES))).astype(jnp.bfloat16)
    b1_p = b1.astype(jnp.float32)                                         # [1, 128]
    bc_p = jnp.pad(bc, ((0, 0), (0, OUT_PAD - OUT_FEATURES))).astype(jnp.float32)
    return w1_p, b1_p, wc_p, bc_p


def reference_forward(x, params):
    """Pure-JAX f32 reference of the original (unfused, eval-mode) forward."""
    (w1, b1), (w2, b2), (w3, b3), (w4, b4) = params
    h = jnp.maximum(x @ w1 + b1, 0.0)
    h = h @ w2 + b2
    h = h @ w3 + b3
    return h @ w4 + b4


if __name__ == "__main__":
    key = jax.random.PRNGKey(0)
    k_params, k_x = jax.random.split(key)

    params = make_params(k_params)
    kernel_params = fold_params(params)

    batch = 8
    x = jax.random.normal(k_x, (batch, IN_FEATURES), jnp.float32)

    out = mycnn_forward(x, kernel_params)
    out = jax.block_until_ready(out)

    ref = reference_forward(x, params)
    assert out.shape == (batch, OUT_FEATURES)
    # bf16 MXU operands with f32 accumulation: allow bf16-level tolerance.
    assert jnp.allclose(out, ref, atol=2e-2, rtol=2e-2), (
        float(jnp.max(jnp.abs(out - ref))))

    print("KERNEL_OK")
</pallas_src>

<mosaic_0001>
module attributes {stable_mosaic.version = 11 : i64} {
  func.func @mlp_kernel(%arg0: i32, %arg1: memref<16x66xf32, #tpu.memory_space<vmem>>, %arg2: memref<66x128xbf16, #tpu.memory_space<vmem>>, %arg3: memref<1x128xf32, #tpu.memory_space<vmem>>, %arg4: memref<128x8xbf16, #tpu.memory_space<vmem>>, %arg5: memref<1x8xf32, #tpu.memory_space<vmem>>, %arg6: memref<16x8xf32, #tpu.memory_space<vmem>>) attributes {dimension_semantics = [#tpu.dimension_semantics<parallel>], iteration_bounds = array<i64: 1>, scalar_prefetch = 0 : i64, scratch_operands = 0 : i64, tpu.core_type = #tpu.core_type<tc>, window_params = [{transform_indices = @transform_0, window_bounds = array<i64: 16, 66>}, {pipeline_mode = #tpu.pipeline_mode<synchronous>, transform_indices = @transform_1, window_bounds = array<i64: 66, 128>}, {pipeline_mode = #tpu.pipeline_mode<synchronous>, transform_indices = @transform_2, window_bounds = array<i64: 1, 128>}, {pipeline_mode = #tpu.pipeline_mode<synchronous>, transform_indices = @transform_3, window_bounds = array<i64: 128, 8>}, {pipeline_mode = #tpu.pipeline_mode<synchronous>, transform_indices = @transform_4, window_bounds = array<i64: 1, 8>}, {transform_indices = @transform_5, window_bounds = array<i64: 16, 8>}]} {
    %c0 = arith.constant 0 : index
    %c0_0 = arith.constant 0 : index
    %0 = vector.load %arg1[%c0, %c0_0] : memref<16x66xf32, #tpu.memory_space<vmem>>, vector<16x66xf32>
    %1 = arith.truncf %0 : vector<16x66xf32> to vector<16x66xbf16>
    %c0_1 = arith.constant 0 : index
    %c0_2 = arith.constant 0 : index
    %2 = vector.load %arg2[%c0_1, %c0_2] : memref<66x128xbf16, #tpu.memory_space<vmem>>, vector<66x128xbf16>
    %cst = arith.constant dense<0.000000e+00> : vector<16x128xf32>
    %3 = tpu.matmul %1, %2, %cst {dimension_numbers = #tpu.dot_dimension_numbers<[1], [0], [0], [1], [0, 0, 1, 1], [], []>} : vector<16x66xbf16>, vector<66x128xbf16>, vector<16x128xf32> -> vector<16x128xf32>
    %c0_3 = arith.constant 0 : index
    %c0_4 = arith.constant 0 : index
    %4 = vector.load %arg3[%c0_3, %c0_4] : memref<1x128xf32, #tpu.memory_space<vmem>>, vector<1x128xf32>
    %5 = vector.broadcast %4 : vector<1x128xf32> to vector<16x128xf32>
    %6 = arith.addf %3, %5 : vector<16x128xf32>
    %cst_5 = arith.constant 0.000000e+00 : f32
    %7 = vector.broadcast %cst_5 : f32 to vector<16x128xf32>
    %8 = arith.maximumf %6, %7 : vector<16x128xf32>
    %9 = arith.truncf %8 : vector<16x128xf32> to vector<16x128xbf16>
    %c0_6 = arith.constant 0 : index
    %c0_7 = arith.constant 0 : index
    %10 = vector.load %arg4[%c0_6, %c0_7] : memref<128x8xbf16, #tpu.memory_space<vmem>>, vector<128x8xbf16>
    %cst_8 = arith.constant dense<0.000000e+00> : vector<16x8xf32>
    %11 = tpu.matmul %9, %10, %cst_8 {dimension_numbers = #tpu.dot_dimension_numbers<[1], [0], [0], [1], [0, 0, 1, 1], [], []>} : vector<16x128xbf16>, vector<128x8xbf16>, vector<16x8xf32> -> vector<16x8xf32>
    %c0_9 = arith.constant 0 : index
    %c0_10 = arith.constant 0 : index
    %12 = vector.load %arg5[%c0_9, %c0_10] : memref<1x8xf32, #tpu.memory_space<vmem>>, vector<1x8xf32>
    %13 = vector.broadcast %12 : vector<1x8xf32> to vector<16x8xf32>
    %14 = arith.addf %11, %13 : vector<16x8xf32>
    %c0_11 = arith.constant 0 : index
    %c0_12 = arith.constant 0 : index
    %15 = vector.load %arg6[%c0_11, %c0_12] : memref<16x8xf32, #tpu.memory_space<vmem>>, vector<16x8xf32>
    tpu.vector_store %arg6[%c0_11, %c0_12], %14 {strides = array<i32>} : memref<16x8xf32, #tpu.memory_space<vmem>>, vector<16x8xf32>,
    return
  }
  func.func @transform_0(%arg0: i32) -> (i32, i32) {
    %c0_i32 = arith.constant 0 : i32
    %c0_i32_0 = arith.constant 0 : i32
    return %arg0, %c0_i32 : i32, i32
  }
  func.func @transform_1(%arg0: i32) -> (i32, i32) {
    %c0_i32 = arith.constant 0 : i32
    %c0_i32_0 = arith.constant 0 : i32
    %c0_i32_1 = arith.constant 0 : i32
    return %c0_i32, %c0_i32_0 : i32, i32
  }
  func.func @transform_2(%arg0: i32) -> (i32, i32) {
    %c0_i32 = arith.constant 0 : i32
    %c0_i32_0 = arith.constant 0 : i32
    %c0_i32_1 = arith.constant 0 : i32
    return %c0_i32, %c0_i32_0 : i32, i32
  }
  func.func @transform_3(%arg0: i32) -> (i32, i32) {
    %c0_i32 = arith.constant 0 : i32
    %c0_i32_0 = arith.constant 0 : i32
    %c0_i32_1 = arith.constant 0 : i32
    return %c0_i32, %c0_i32_0 : i32, i32
  }
  func.func @transform_4(%arg0: i32) -> (i32, i32) {
    %c0_i32 = arith.constant 0 : i32
    %c0_i32_0 = arith.constant 0 : i32
    %c0_i32_1 = arith.constant 0 : i32
    return %c0_i32, %c0_i32_0 : i32, i32
  }
  func.func @transform_5(%arg0: i32) -> (i32, i32) {
    %c0_i32 = arith.constant 0 : i32
    %c0_i32_0 = arith.constant 0 : i32
    return %arg0, %c0_i32 : i32, i32
  }
}

</mosaic_0001>

<bundles_post_ra>
// kernel: tpu_custom_call.1
= control target key start
LH: loop header
LB: loop body
LE: loop exit
PB: predicated region body
PF: predicated region fallthrough
CT: control target
= control target key end

     0   :  { %v318_v0 = vmov 0.0   ;;  %vm319_vm0 = vmmov 0   ;;  %vm71_vm1 = vcmask 1040384   ;;  %vm67_vm2 = vcmask 539648   ;;  %s407_s1 = inlined_call_operand.vmem [shape: bf16[66,128], index: 1, kind: input, shape index: {}]   ;;  %s408_s3 = inlined_call_operand.vmem [shape: bf16[128,8], index: 3, kind: input, shape index: {}]   ;;  %s409_s0 = inlined_call_operand.vmem [shape: f32[16,66], index: 0, kind: input, shape index: {}]   ;;  %s410_s2 = inlined_call_operand.vmem [shape: f32[1,128], index: 2, kind: input, shape index: {}]   ;;  %s411_s4 = inlined_call_operand.vmem [shape: f32[1,8], index: 4, kind: input, shape index: {}]   ;;  %s412_s5 = inlined_call_operand.vmem [shape: f32[16,8], index: 5, kind: output, shape index: {}]  }
   0x1   :  { %269 = vmatprep.subr.bf16.mxu0 %v318_v0  ;;  %v305_v1 = vld [vmem:[%s407_s1] sm:$0xff]   ;;  %279 = vmatprep.mubr.msk.bf16.mxu0 %vm319_vm0, %v318_v0  ;;  %v306_v2 = vld [vmem:[%s407_s1 + $0x8] sm:$0xff]   ;;  %v307_v3 = vld [vmem:[%s407_s1 + $0x10] sm:$0xff]   ;;  %vm231_vm3 = vcmask 64512  }
   0x2   :  { %283 = vmatprep.subr.bf16.mxu1 %v318_v0  ;;  %299 = vmatprep.mubr.msk.bf16.mxu1 %vm319_vm0, %v318_v0  ;;  %v310_v4 = vld [vmem:[%s408_s3] sm:$0xff]   ;;  %v311_v5 = vld [vmem:[%s408_s3 + $0x8] sm:$0xff]   ;;  %v308_v6 = vld [vmem:[%s407_s1 + $0x18] sm:$0xff]  }
   0x3   :  { %270 = vmatpush3.bf16.msra.mxu0 %v305_v1  ;;  %284 = vmatpush3.bf16.msra.mxu1 %v310_v4  ;;  %v309_v7 = vld [vmem:[%s407_s1 + $0x20] ss:$0 sps:$4 sm:$0x11]   ;;  %v312_v8 = vld [vmem:[%s408_s3 + $0x10] sm:$0xff]   ;;  %v22_v10 = vld [vmem:[%s409_s0 + $0x8] sm:$0xff] }
   0x4   :  { %271 = vmatprep.subr.bf16.mxu0 %v318_v0  ;;  %285 = vmatprep.subr.bf16.mxu1 %v318_v0  ;;  %v21_v9 = vld [vmem:[%s409_s0] sm:$0xff]  ;;  %v73_v11 = vsel %vm71_vm1, %v309_v7, 0  ;;  %v313_v12 = vld [vmem:[%s408_s3 + $0x18] sm:$0xff]   ;;  %v315_v15 = vld [vmem:[%s408_s3 + $0x28] sm:$0xff]  }
   0x5   :  { %v23_v13 = vpack.c.bf16 %v22_v10, %v21_v9  ;;  %v314_v14 = vld [vmem:[%s408_s3 + $0x20] sm:$0xff]   ;;  %v316_v16 = vld [vmem:[%s408_s3 + $0x30] sm:$0xff]   ;;  %v317_v17 = vld [vmem:[%s408_s3 + $0x38] sm:$0xff]  }
   0x6   :  { %v238_v18 = vld [vmem:[%s410_s2] ss:$0 sm:$0xff] }
   0x7   :  { %272 = vmatpush3.bf16.msra.mxu0 %v306_v2  ;;  %286 = vmatpush3.bf16.msra.mxu1 %v311_v5  ;;  %v245_v28 = vld [vmem:[%s411_s4] ss:$0 sm:$0xff] }
   0x8   :  { %273 = vmatprep.subr.bf16.mxu0 %v318_v0  ;;  %287 = vmatprep.subr.bf16.mxu1 %v318_v0 }
   0xb   :  { %274 = vmatpush3.bf16.msra.mxu0 %v307_v3  ;;  %288 = vmatpush3.bf16.msra.mxu1 %v312_v8 }
   0xc   :  { %275 = vmatprep.subr.bf16.mxu0 %v318_v0  ;;  %289 = vmatprep.subr.bf16.mxu1 %v318_v0 }
   0xf   :  { %276 = vmatpush3.bf16.msra.mxu0 %v308_v6  ;;  %290 = vmatpush3.bf16.msra.mxu1 %v313_v12 }
  0x10   :  { %277 = vmatprep.subr.bf16.mxu0 %v318_v0  ;;  %291 = vmatprep.subr.bf16.mxu1 %v318_v0 }
  0x13   :  { %278 = vmatpush3.bf16.msra.mxu0 %v73_v11  ;;  %292 = vmatpush3.bf16.msra.mxu1 %v314_v14 }
  0x14   :  { %293 = vmatprep.subr.bf16.mxu1 %v318_v0 }
  0x16   :  { %280 = vmatmul.mubr.msk.bf16.vlgmr.msra.gmra.mrb[0].mxu0 %vm67_vm2, %v23_v13 }
  0x17   :  { %294 = vmatpush3.bf16.msra.mxu1 %v315_v15 }
  0x18   :  { %295 = vmatprep.subr.bf16.mxu1 %v318_v0 }
  0x1b   :  { %296 = vmatpush3.bf16.msra.mxu1 %v316_v16 }
  0x1c   :  { %297 = vmatprep.subr.bf16.mxu1 %v318_v0 }
  0x1f   :  { %298 = vmatpush3.bf16.msra.mxu1 %v317_v17 }
  0xe9   :  { %v109_v19 = vpop.f32.mrb[0].mxu0 }
  0xea   :  { %v110_v20 = vadd.f32 %v238_v18, %v109_v19  ;;  %v281_v21 = vpop.f32.mrb[1].mxu0 }
  0xeb   :  { %v112_v22 = vpop.f32.mrb[2].mxu0 }
  0xec   :  { %v113_v23 = vadd.f32 %v238_v18, %v112_v22  ;;  %v282_v24 = vpop.f32.mrb[3].mxu0  ;;  %v116_v25 = vmax.f32 %v110_v20, 0.0 }
  0xee   :  { %v117_v26 = vmax.f32 %v113_v23, 0.0 }
  0xf0   :  { %v118_v27 = vpack.c.bf16 %v117_v26, %v116_v25 }
  0xf2   :  { %300 = vmatmul.mubr.bf16.vlgmr.msra.gmra.mrb[0].mxu1 %v118_v27 }
 0x1c5   :  { %v224_v29 = vpop.f32.mrb[0].mxu1 }
 0x1c6   :  { %v225_v30 = vadd.f32 %v245_v28, %v224_v29  ;;  %v301_v31 = vpop.f32.mrb[1].mxu1 }
 0x1c7   :  { %v227_v32 = vpop.f32.mrb[2].mxu1 }
 0x1c8   :  { %232 = vst.msk [vmem:[%s412_s5] sm:$0xff] %vm231_vm3, %v225_v30  ;;  %v228_v33 = vadd.f32 %v245_v28, %v227_v32  ;;  %v302_v34 = vpop.f32.mrb[3].mxu1 }
 0x1ca   :  { %233 = vst.msk [vmem:[%s412_s5 + $0x8] sm:$0xff] %vm231_vm3, %v228_v33 }

</bundles_post_ra>
